<compile_context>
chip_gen: v7x
topology: tpu7x:2x2x1
jax: 0.10.0
libtpu: 0.0.40
codegen_flags: <defaults>
</compile_context>

<pallas_src>
import functools
import math

import jax
import jax.numpy as jnp
from jax import lax
from jax.experimental import pallas as pl
from jax.experimental.pallas import tpu as pltpu


def _round_up(x: int, m: int) -> int:
    return (x + m - 1) // m * m


def _simclr_kernel(qa_ref, qb_ref, ka_ref, kb_ref, out_ref,
                   qa_s, qb_s, m_a, l_a, m_b, l_b,
                   *, tau, n_valid, nk, has_pad, sum_via_mxu):
    qi = pl.program_id(0)
    ki = pl.program_id(1)
    tq = qa_ref.shape[0]
    tk = ka_ref.shape[0]

    f32 = jnp.float32
    inv_tau = f32(1.0 / tau)
    neg_big = f32(-1.0e9)

    # ---- ki-invariant query prep, hoisted: scale by 1/tau once, cast to the
    # MXU feed dtype, and keep it in VMEM scratch for the whole key sweep.
    @pl.when(ki == 0)
    def _init():
        qa_s[...] = (qa_ref[...].astype(f32) * inv_tau).astype(qa_s.dtype)
        qb_s[...] = (qb_ref[...].astype(f32) * inv_tau).astype(qb_s.dtype)
        m_a[...] = jnp.full_like(m_a, -jnp.inf)
        l_a[...] = jnp.zeros_like(l_a)
        m_b[...] = jnp.full_like(m_b, -jnp.inf)
        l_b[...] = jnp.zeros_like(l_b)

    qa = qa_s[...]
    qb = qb_s[...]
    ka = ka_ref[...]
    kb = kb_ref[...]

    # ---- Gram blocks on the MXU (f32 accumulation), transposed layout:
    # rows = keys (sublanes), cols = queries (lanes), so per-query statistics
    # and the output are lane-dense (1, tq).
    dims = (((1,), (1,)), ((), ()))  # contract the embedding axis of both.
    s_ab = lax.dot_general(kb, qa, dims, preferred_element_type=f32)  # (tk,tq)
    s_aa = lax.dot_general(ka, qa, dims, preferred_element_type=f32)
    s_ba = lax.dot_general(ka, qb, dims, preferred_element_type=f32)
    s_bb = lax.dot_general(kb, qb, dims, preferred_element_type=f32)

    q0 = qi * tq
    k0 = ki * tk

    # ---- Self-similarity (diagonal) mask, only on tiles that intersect the
    # diagonal (single iota-difference compare against a scalar).
    def _mask_diag(s_aa_, s_bb_):
        kr = lax.broadcasted_iota(jnp.int32, (tk, tq), 0)
        qc = lax.broadcasted_iota(jnp.int32, (tk, tq), 1)
        diag = (kr - qc) == (q0 - k0)
        return jnp.where(diag, neg_big, s_aa_), jnp.where(diag, neg_big, s_bb_)

    def _no_diag(s_aa_, s_bb_):
        return s_aa_, s_bb_

    diag_hit = jnp.logical_and(k0 < q0 + tq, q0 < k0 + tk)
    s_aa, s_bb = lax.cond(diag_hit, _mask_diag, _no_diag, s_aa, s_bb)

    # ---- Key-padding mask: only if padding exists (trace-time) and only on
    # the last key block (runtime).  Safe with the online LSE: key block 0
    # always contains >= 1 real key, so m is finite after the first update.
    if has_pad:
        def _mask_pad(s_ab_, s_aa_, s_ba_, s_bb_):
            kr = lax.broadcasted_iota(jnp.int32, (tk, tq), 0) + k0
            pad = kr >= n_valid
            return (jnp.where(pad, neg_big, s_ab_),
                    jnp.where(pad, neg_big, s_aa_),
                    jnp.where(pad, neg_big, s_ba_),
                    jnp.where(pad, neg_big, s_bb_))

        if nk == 1:
            s_ab, s_aa, s_ba, s_bb = _mask_pad(s_ab, s_aa, s_ba, s_bb)
        else:
            s_ab, s_aa, s_ba, s_bb = lax.cond(
                ki == nk - 1, _mask_pad,
                lambda a, b, c, d: (a, b, c, d),
                s_ab, s_aa, s_ba, s_bb)

    # ---- Online logsumexp over the key (sublane) axis: cross-entropy
    # denominator over the concatenation [pos | neg] without materialising it.
    if sum_via_mxu:
        ones_row = jnp.ones((1, tk), f32)

    def _update(m_ref, l_ref, pos, neg):
        m_prev = m_ref[...]
        m_new = jnp.maximum(
            m_prev,
            jnp.maximum(jnp.max(pos, axis=0, keepdims=True),
                        jnp.max(neg, axis=0, keepdims=True)))
        p_pos = jnp.exp(pos - m_new)
        p_neg = jnp.exp(neg - m_new)
        if sum_via_mxu:
            # Lane-wise exp-sums as ones-vector matmuls: uses MXU slack instead
            # of the (co-bottleneck) XLU on v6e/v7x.
            s = (jnp.dot(ones_row, p_pos, preferred_element_type=f32)
                 + jnp.dot(ones_row, p_neg, preferred_element_type=f32))
        else:
            s = (jnp.sum(p_pos, axis=0, keepdims=True)
                 + jnp.sum(p_neg, axis=0, keepdims=True))
        l_ref[...] = jnp.exp(m_prev - m_new) * l_ref[...] + s
        m_ref[...] = m_new

    _update(m_a, l_a, s_ab, s_aa)   # loss_a: pos = logits_ab, neg = logits_aa
    _update(m_b, l_b, s_ba, s_bb)   # loss_b: pos = logits_ba, neg = logits_bb

    @pl.when(ki == nk - 1)
    def _finish():
        lse_a = m_a[...] + jnp.log(l_a[...])
        lse_b = m_b[...] + jnp.log(l_b[...])
        out_ref[0] = lse_a + lse_b   # (1, tq) lane-dense store, once per qi


def simclr_loss(aug1_embed, aug2_embed, temperature: float = 0.1, *,
                mxu_dtype=jnp.bfloat16, block_q: int = 512,
                block_k: int = 1024, sum_via_mxu: bool = True,
                vmem_limit_bytes=None):
    """Pallas TPU implementation of SIMCLRLoss.forward.  Returns a scalar f32.

    mxu_dtype=jnp.bfloat16 stores the padded operands in HBM at bf16 (halves
    key streaming) and feeds the MXU in bf16 with f32 accumulation; pass
    jnp.float32 for the exact-f32 path.  sum_via_mxu=True moves the softmax
    exp-sums onto the MXU (recommended on v6e/v7x); set False on v5e.
    For very large embed dims (>~1024) lower block_k or raise vmem_limit_bytes.
    """
    assert aug1_embed.shape == aug2_embed.shape and aug1_embed.ndim == 2
    n, d = aug1_embed.shape
    assert n >= 1
    assert block_q % 8 == 0 and block_k % 8 == 0

    q_a32 = aug1_embed.astype(jnp.float32)
    q_b32 = aug2_embed.astype(jnp.float32)

    # Lane-dense padding: embed dim to a multiple of 128 (zero pad => dot
    # products unchanged), batch to the tile grid (padded key rows masked
    # in-kernel, padded query columns dropped before the mean).
    d_pad = _round_up(d, 128)
    if n <= block_q:
        # Small batch: two query blocks so the "parallel" query axis spans
        # both TensorCores on v7x; a single key block.
        n_pad = max(_round_up(n, 16), 16)
        tq = n_pad // 2
        tk = n_pad
    else:
        tq, tk = block_q, block_k
        n_pad = _round_up(n, math.lcm(tq, tk))

    def prep(x32):
        x = jnp.pad(x32, ((0, n_pad - n), (0, d_pad - d)))
        return x.astype(mxu_dtype)

    a_in = prep(q_a32)
    b_in = prep(q_b32)

    nq, nk = n_pad // tq, n_pad // tk
    kernel = functools.partial(
        _simclr_kernel, tau=float(temperature), n_valid=n, nk=nk,
        has_pad=(n_pad > n), sum_via_mxu=sum_via_mxu)

    if vmem_limit_bytes is None:
        # Large enough for the default (512, 1024) tiles, small enough to fit
        # v7x's 64 MiB physical VMEM with headroom.
        vmem_limit_bytes = 48 * 1024 * 1024

    q_spec = pl.BlockSpec((tq, d_pad), lambda qi, ki: (qi, 0))
    k_spec = pl.BlockSpec((tk, d_pad), lambda qi, ki: (ki, 0))

    lse_sum = pl.pallas_call(
        kernel,
        out_shape=jax.ShapeDtypeStruct((nq, 1, tq), jnp.float32),
        grid_spec=pltpu.PrefetchScalarGridSpec(
            num_scalar_prefetch=0,
            grid=(nq, nk),
            in_specs=[q_spec, q_spec, k_spec, k_spec],
            out_specs=pl.BlockSpec((1, 1, tq), lambda qi, ki: (qi, 0, 0)),
            scratch_shapes=[
                pltpu.VMEM((tq, d_pad), mxu_dtype),    # scaled q_a (hoisted)
                pltpu.VMEM((tq, d_pad), mxu_dtype),    # scaled q_b (hoisted)
                pltpu.VMEM((1, tq), jnp.float32),      # m_a
                pltpu.VMEM((1, tq), jnp.float32),      # l_a
                pltpu.VMEM((1, tq), jnp.float32),      # m_b
                pltpu.VMEM((1, tq), jnp.float32),      # l_b
            ]),
        compiler_params=pltpu.CompilerParams(
            dimension_semantics=("parallel", "arbitrary"),
            vmem_limit_bytes=vmem_limit_bytes),
    )(a_in, b_in, a_in, b_in)

    lse_sum = lse_sum.reshape(n_pad)[:n]
    # Correct-class logit diag(q_a @ q_b.T)/tau: exact f32 row-wise dot, O(N*D),
    # done in plain XLA (cheaper and more precise than any in-kernel variant).
    c = jnp.sum(q_a32 * q_b32, axis=1) / jnp.float32(temperature)
    # (loss_a + loss_b) / 2 = 0.5 * mean over rows of (lse_a + lse_b - 2c).
    return 0.5 * jnp.mean(lse_sum - 2.0 * c)


def _simclr_loss_ref(q_a, q_b, tau=0.1):
    """Pure-JAX reference mirroring the PyTorch module."""
    n = q_a.shape[0]
    q_a = q_a.astype(jnp.float32)
    q_b = q_b.astype(jnp.float32)
    masks = jnp.eye(n, dtype=jnp.float32) * 1.0e9
    logits_aa = q_a @ q_a.T / tau - masks
    logits_bb = q_b @ q_b.T / tau - masks
    logits_ab = q_a @ q_b.T / tau
    logits_ba = q_b @ q_a.T / tau
    logit1 = jnp.concatenate([logits_ab, logits_aa], axis=1)
    logit2 = jnp.concatenate([logits_ba, logits_bb], axis=1)
    labels = jnp.arange(n)

    def ce(logits):
        lse = jax.nn.logsumexp(logits, axis=1)
        return jnp.mean(lse - logits[jnp.arange(n), labels])

    return (ce(logit1) + ce(logit2)) * 0.5


if __name__ == "__main__":
    key = jax.random.PRNGKey(0)

    # Small shape consistent with the module: (batch_size, embedding_dim).
    N, D = 8, 32
    k1, k2 = jax.random.split(key)
    aug1 = jax.random.normal(k1, (N, D), dtype=jnp.float32)
    aug2 = jax.random.normal(k2, (N, D), dtype=jnp.float32)
    ref = _simclr_loss_ref(aug1, aug2, tau=0.1)

    # Exact f32 MXU path (sum-via-MXU on).
    loss_f32 = jax.block_until_ready(
        simclr_loss(aug1, aug2, 0.1, mxu_dtype=jnp.float32))
    assert jnp.allclose(loss_f32, ref, rtol=1e-4, atol=1e-4), (loss_f32, ref)

    # XLU-reduction fallback (recommended configuration on v5e).
    loss_xlu = jax.block_until_ready(
        simclr_loss(aug1, aug2, 0.1, mxu_dtype=jnp.float32, sum_via_mxu=False))
    assert jnp.allclose(loss_xlu, ref, rtol=1e-4, atol=1e-4), (loss_xlu, ref)

    # Default bf16 HBM storage + bf16-fed MXU (f32 accumulation) — loose check.
    loss_bf16 = jax.block_until_ready(simclr_loss(aug1, aug2, 0.1))
    assert jnp.allclose(loss_bf16, ref, rtol=5e-2, atol=2.0), (loss_bf16, ref)

    # Larger shape: single key block per query row (nk=1), padding masked at
    # trace time, D=96 -> 128 lanes, N=640 -> 1024 rows, grid (2, 1).
    N2, D2 = 640, 96
    k3, k4 = jax.random.split(k2)
    a2 = jax.random.normal(k3, (N2, D2), dtype=jnp.float32)
    b2 = jax.random.normal(k4, (N2, D2), dtype=jnp.float32)
    ref2 = _simclr_loss_ref(a2, b2, tau=0.1)
    loss2 = jax.block_until_ready(
        simclr_loss(a2, b2, 0.1, mxu_dtype=jnp.float32))
    assert jnp.allclose(loss2, ref2, rtol=2e-3, atol=1e-2), (loss2, ref2)

    # Multi key-block grid (3, 3): exercises the online LSE across key steps
    # and the runtime diag/pad lax.cond paths.
    loss3 = jax.block_until_ready(
        simclr_loss(a2, b2, 0.1, mxu_dtype=jnp.float32,
                    block_q=256, block_k=256))
    assert jnp.allclose(loss3, ref2, rtol=2e-3, atol=1e-2), (loss3, ref2)

    print("KERNEL_OK")
</pallas_src>

<mosaic_0001>
module attributes {stable_mosaic.version = 11 : i64} {
  func.func @_simclr_kernel(%arg0: i32, %arg1: i32, %arg2: memref<8x128xf32, #tpu.memory_space<vmem>>, %arg3: memref<8x128xf32, #tpu.memory_space<vmem>>, %arg4: memref<16x128xf32, #tpu.memory_space<vmem>>, %arg5: memref<16x128xf32, #tpu.memory_space<vmem>>, %arg6: memref<1x1x8xf32, #tpu.memory_space<vmem>>, %arg7: memref<8x128xf32, #tpu.memory_space<vmem>>, %arg8: memref<8x128xf32, #tpu.memory_space<vmem>>, %arg9: memref<1x8xf32, #tpu.memory_space<vmem>>, %arg10: memref<1x8xf32, #tpu.memory_space<vmem>>, %arg11: memref<1x8xf32, #tpu.memory_space<vmem>>, %arg12: memref<1x8xf32, #tpu.memory_space<vmem>>) attributes {dimension_semantics = [#tpu.dimension_semantics<parallel>, #tpu.dimension_semantics<arbitrary>], iteration_bounds = array<i64: 2, 1>, scalar_prefetch = 0 : i64, scratch_operands = 6 : i64, tpu.core_type = #tpu.core_type<tc>, window_params = [{transform_indices = @transform_0, window_bounds = array<i64: 8, 128>}, {transform_indices = @transform_1, window_bounds = array<i64: 8, 128>}, {transform_indices = @transform_2, window_bounds = array<i64: 16, 128>}, {transform_indices = @transform_3, window_bounds = array<i64: 16, 128>}, {transform_indices = @transform_4, window_bounds = array<i64: 1, 1, 8>}]} {
    %c0_i32 = arith.constant 0 : i32
    %0 = arith.cmpi eq, %arg1, %c0_i32 : i32
    %1 = arith.extui %0 : i1 to i32
    %cst = arith.constant 1.000000e+01 : f32
    %c0_i32_0 = arith.constant 0 : i32
    %2 = arith.cmpi ne, %1, %c0_i32_0 : i32
    scf.if %2 {
      %c0_48 = arith.constant 0 : index
      %c0_49 = arith.constant 0 : index
      %84 = vector.load %arg2[%c0_48, %c0_49] : memref<8x128xf32, #tpu.memory_space<vmem>>, vector<8x128xf32>
      %85 = vector.broadcast %cst : f32 to vector<8x128xf32>
      %86 = arith.mulf %84, %85 : vector<8x128xf32>
      %c0_50 = arith.constant 0 : index
      %c0_51 = arith.constant 0 : index
      %87 = vector.load %arg7[%c0_50, %c0_51] : memref<8x128xf32, #tpu.memory_space<vmem>>, vector<8x128xf32>
      tpu.vector_store %arg7[%c0_50, %c0_51], %86 {strides = array<i32>} : memref<8x128xf32, #tpu.memory_space<vmem>>, vector<8x128xf32>,
      %c0_52 = arith.constant 0 : index
      %c0_53 = arith.constant 0 : index
      %88 = vector.load %arg3[%c0_52, %c0_53] : memref<8x128xf32, #tpu.memory_space<vmem>>, vector<8x128xf32>
      %89 = vector.broadcast %cst : f32 to vector<8x128xf32>
      %90 = arith.mulf %88, %89 : vector<8x128xf32>
      %c0_54 = arith.constant 0 : index
      %c0_55 = arith.constant 0 : index
      %91 = vector.load %arg8[%c0_54, %c0_55] : memref<8x128xf32, #tpu.memory_space<vmem>>, vector<8x128xf32>
      tpu.vector_store %arg8[%c0_54, %c0_55], %90 {strides = array<i32>} : memref<8x128xf32, #tpu.memory_space<vmem>>, vector<8x128xf32>,
      %cst_56 = arith.constant 0xFF800000 : f32
      %92 = vector.broadcast %cst_56 : f32 to vector<1x8xf32>
      %c0_57 = arith.constant 0 : index
      %c0_58 = arith.constant 0 : index
      %93 = vector.load %arg9[%c0_57, %c0_58] : memref<1x8xf32, #tpu.memory_space<vmem>>, vector<1x8xf32>
      tpu.vector_store %arg9[%c0_57, %c0_58], %92 {strides = array<i32>} : memref<1x8xf32, #tpu.memory_space<vmem>>, vector<1x8xf32>,
      %cst_59 = arith.constant 0.000000e+00 : f32
      %94 = vector.broadcast %cst_59 : f32 to vector<1x8xf32>
      %c0_60 = arith.constant 0 : index
      %c0_61 = arith.constant 0 : index
      %95 = vector.load %arg10[%c0_60, %c0_61] : memref<1x8xf32, #tpu.memory_space<vmem>>, vector<1x8xf32>
      tpu.vector_store %arg10[%c0_60, %c0_61], %94 {strides = array<i32>} : memref<1x8xf32, #tpu.memory_space<vmem>>, vector<1x8xf32>,
      %cst_62 = arith.constant 0xFF800000 : f32
      %96 = vector.broadcast %cst_62 : f32 to vector<1x8xf32>
      %c0_63 = arith.constant 0 : index
      %c0_64 = arith.constant 0 : index
      %97 = vector.load %arg11[%c0_63, %c0_64] : memref<1x8xf32, #tpu.memory_space<vmem>>, vector<1x8xf32>
      tpu.vector_store %arg11[%c0_63, %c0_64], %96 {strides = array<i32>} : memref<1x8xf32, #tpu.memory_space<vmem>>, vector<1x8xf32>,
      %cst_65 = arith.constant 0.000000e+00 : f32
      %98 = vector.broadcast %cst_65 : f32 to vector<1x8xf32>
      %c0_66 = arith.constant 0 : index
      %c0_67 = arith.constant 0 : index
      %99 = vector.load %arg12[%c0_66, %c0_67] : memref<1x8xf32, #tpu.memory_space<vmem>>, vector<1x8xf32>
      tpu.vector_store %arg12[%c0_66, %c0_67], %98 {strides = array<i32>} : memref<1x8xf32, #tpu.memory_space<vmem>>, vector<1x8xf32>,
    } else {
    }
    %c0 = arith.constant 0 : index
    %c0_1 = arith.constant 0 : index
    %3 = vector.load %arg7[%c0, %c0_1] : memref<8x128xf32, #tpu.memory_space<vmem>>, vector<8x128xf32>
    %c0_2 = arith.constant 0 : index
    %c0_3 = arith.constant 0 : index
    %4 = vector.load %arg8[%c0_2, %c0_3] : memref<8x128xf32, #tpu.memory_space<vmem>>, vector<8x128xf32>
    %c0_4 = arith.constant 0 : index
    %c0_5 = arith.constant 0 : index
    %5 = vector.load %arg4[%c0_4, %c0_5] : memref<16x128xf32, #tpu.memory_space<vmem>>, vector<16x128xf32>
    %c0_6 = arith.constant 0 : index
    %c0_7 = arith.constant 0 : index
    %6 = vector.load %arg5[%c0_6, %c0_7] : memref<16x128xf32, #tpu.memory_space<vmem>>, vector<16x128xf32>
    %cst_8 = arith.constant dense<0.000000e+00> : vector<16x8xf32>
    %7 = tpu.matmul %6, %3, %cst_8 {dimension_numbers = #tpu.dot_dimension_numbers<[1], [1], [0], [0], [0, 0, 1, 0], [], []>} : vector<16x128xf32>, vector<8x128xf32>, vector<16x8xf32> -> vector<16x8xf32>
    %cst_9 = arith.constant dense<0.000000e+00> : vector<16x8xf32>
    %8 = tpu.matmul %5, %3, %cst_9 {dimension_numbers = #tpu.dot_dimension_numbers<[1], [1], [0], [0], [0, 0, 1, 0], [], []>} : vector<16x128xf32>, vector<8x128xf32>, vector<16x8xf32> -> vector<16x8xf32>
    %cst_10 = arith.constant dense<0.000000e+00> : vector<16x8xf32>
    %9 = tpu.matmul %5, %4, %cst_10 {dimension_numbers = #tpu.dot_dimension_numbers<[1], [1], [0], [0], [0, 0, 1, 0], [], []>} : vector<16x128xf32>, vector<8x128xf32>, vector<16x8xf32> -> vector<16x8xf32>
    %cst_11 = arith.constant dense<0.000000e+00> : vector<16x8xf32>
    %10 = tpu.matmul %6, %4, %cst_11 {dimension_numbers = #tpu.dot_dimension_numbers<[1], [1], [0], [0], [0, 0, 1, 0], [], []>} : vector<16x128xf32>, vector<8x128xf32>, vector<16x8xf32> -> vector<16x8xf32>
    %c8_i32 = arith.constant 8 : i32
    %11 = arith.muli %arg0, %c8_i32 : i32
    %c16_i32 = arith.constant 16 : i32
    %12 = arith.muli %arg1, %c16_i32 : i32
    %c8_i32_12 = arith.constant 8 : i32
    %13 = arith.addi %11, %c8_i32_12 : i32
    %14 = arith.cmpi slt, %12, %13 : i32
    %c16_i32_13 = arith.constant 16 : i32
    %15 = arith.addi %12, %c16_i32_13 : i32
    %16 = arith.cmpi slt, %11, %15 : i32
    %17 = arith.andi %14, %16 : i1
    %18 = arith.extui %17 : i1 to i32
    %cst_14 = arith.constant -1.000000e+09 : f32
    %c0_i32_15 = arith.constant 0 : i32
    %19 = arith.cmpi ne, %18, %c0_i32_15 : i32
    %20:2 = scf.if %19 -> (vector<16x8xf32>, vector<16x8xf32>) {
      %84 = tpu.iota {dimensions = array<i32: 0>} : vector<16x8xi32>
      %85 = tpu.iota {dimensions = array<i32: 1>} : vector<16x8xi32>
      %86 = arith.subi %84, %85 : vector<16x8xi32>
      %87 = arith.subi %11, %12 : i32
      %88 = vector.broadcast %87 : i32 to vector<16x8xi32>
      %89 = arith.cmpi eq, %86, %88 : vector<16x8xi32>
      %90 = vector.broadcast %cst_14 : f32 to vector<16x8xf32>
      %91 = arith.select %89, %90, %8 : vector<16x8xi1>, vector<16x8xf32>
      %92 = vector.broadcast %cst_14 : f32 to vector<16x8xf32>
      %93 = arith.select %89, %92, %10 : vector<16x8xi1>, vector<16x8xf32>
      scf.yield %91, %93 : vector<16x8xf32>, vector<16x8xf32>
    } else {
      scf.yield %8, %10 : vector<16x8xf32>, vector<16x8xf32>
    }
    %21 = tpu.iota {dimensions = array<i32: 0>} : vector<16x8xi32>
    %22 = vector.broadcast %12 : i32 to vector<16x8xi32>
    %23 = arith.addi %21, %22 : vector<16x8xi32>
    %c8_i32_16 = arith.constant 8 : i32
    %24 = vector.broadcast %c8_i32_16 : i32 to vector<16x8xi32>
    %25 = arith.cmpi sge, %23, %24 : vector<16x8xi32>
    %cst_17 = arith.constant -1.000000e+09 : f32
    %26 = vector.broadcast %cst_17 : f32 to vector<16x8xf32>
    %27 = arith.select %25, %26, %7 : vector<16x8xi1>, vector<16x8xf32>
    %cst_18 = arith.constant -1.000000e+09 : f32
    %28 = vector.broadcast %cst_18 : f32 to vector<16x8xf32>
    %29 = arith.select %25, %28, %20#0 : vector<16x8xi1>, vector<16x8xf32>
    %cst_19 = arith.constant -1.000000e+09 : f32
    %30 = vector.broadcast %cst_19 : f32 to vector<16x8xf32>
    %31 = arith.select %25, %30, %9 : vector<16x8xi1>, vector<16x8xf32>
    %cst_20 = arith.constant -1.000000e+09 : f32
    %32 = vector.broadcast %cst_20 : f32 to vector<16x8xf32>
    %33 = arith.select %25, %32, %20#1 : vector<16x8xi1>, vector<16x8xf32>
    %cst_21 = arith.constant 1.000000e+00 : f32
    %34 = vector.broadcast %cst_21 : f32 to vector<1x16xf32>
    %c0_22 = arith.constant 0 : index
    %c0_23 = arith.constant 0 : index
    %35 = vector.load %arg9[%c0_22, %c0_23] : memref<1x8xf32, #tpu.memory_space<vmem>>, vector<1x8xf32>
    %cst_24 = arith.constant dense<0xFF800000> : vector<8xf32>
    %36 = vector.multi_reduction <maximumf>, %27, %cst_24 [0] : vector<16x8xf32> to vector<8xf32>
    %37 = vector.shape_cast %36 : vector<8xf32> to vector<1x8xf32>
    %cst_25 = arith.constant dense<0xFF800000> : vector<8xf32>
    %38 = vector.multi_reduction <maximumf>, %29, %cst_25 [0] : vector<16x8xf32> to vector<8xf32>
    %39 = vector.shape_cast %38 : vector<8xf32> to vector<1x8xf32>
    %40 = arith.maximumf %37, %39 : vector<1x8xf32>
    %41 = arith.maximumf %35, %40 : vector<1x8xf32>
    %42 = vector.broadcast %41 : vector<1x8xf32> to vector<16x8xf32>
    %43 = arith.subf %27, %42 : vector<16x8xf32>
    %44 = math.exp %43 : vector<16x8xf32>
    %45 = vector.broadcast %41 : vector<1x8xf32> to vector<16x8xf32>
    %46 = arith.subf %29, %45 : vector<16x8xf32>
    %47 = math.exp %46 : vector<16x8xf32>
    %cst_26 = arith.constant dense<0.000000e+00> : vector<1x8xf32>
    %48 = tpu.matmul %34, %44, %cst_26 {dimension_numbers = #tpu.dot_dimension_numbers<[1], [0], [0], [1], [0, 0, 1, 1], [], []>} : vector<1x16xf32>, vector<16x8xf32>, vector<1x8xf32> -> vector<1x8xf32>
    %cst_27 = arith.constant dense<0.000000e+00> : vector<1x8xf32>
    %49 = tpu.matmul %34, %47, %cst_27 {dimension_numbers = #tpu.dot_dimension_numbers<[1], [0], [0], [1], [0, 0, 1, 1], [], []>} : vector<1x16xf32>, vector<16x8xf32>, vector<1x8xf32> -> vector<1x8xf32>
    %50 = arith.addf %48, %49 : vector<1x8xf32>
    %51 = arith.subf %35, %41 : vector<1x8xf32>
    %52 = math.exp %51 : vector<1x8xf32>
    %c0_28 = arith.constant 0 : index
    %c0_29 = arith.constant 0 : index
    %53 = vector.load %arg10[%c0_28, %c0_29] : memref<1x8xf32, #tpu.memory_space<vmem>>, vector<1x8xf32>
    %54 = arith.mulf %52, %53 : vector<1x8xf32>
    %55 = arith.addf %54, %50 : vector<1x8xf32>
    %c0_30 = arith.constant 0 : index
    %c0_31 = arith.constant 0 : index
    %56 = vector.load %arg10[%c0_30, %c0_31] : memref<1x8xf32, #tpu.memory_space<vmem>>, vector<1x8xf32>
    tpu.vector_store %arg10[%c0_30, %c0_31], %55 {strides = array<i32>} : memref<1x8xf32, #tpu.memory_space<vmem>>, vector<1x8xf32>,
    %c0_32 = arith.constant 0 : index
    %c0_33 = arith.constant 0 : index
    %57 = vector.load %arg9[%c0_32, %c0_33] : memref<1x8xf32, #tpu.memory_space<vmem>>, vector<1x8xf32>
    tpu.vector_store %arg9[%c0_32, %c0_33], %41 {strides = array<i32>} : memref<1x8xf32, #tpu.memory_space<vmem>>, vector<1x8xf32>,
    %c0_34 = arith.constant 0 : index
    %c0_35 = arith.constant 0 : index
    %58 = vector.load %arg11[%c0_34, %c0_35] : memref<1x8xf32, #tpu.memory_space<vmem>>, vector<1x8xf32>
    %cst_36 = arith.constant dense<0xFF800000> : vector<8xf32>
    %59 = vector.multi_reduction <maximumf>, %31, %cst_36 [0] : vector<16x8xf32> to vector<8xf32>
    %60 = vector.shape_cast %59 : vector<8xf32> to vector<1x8xf32>
    %cst_37 = arith.constant dense<0xFF800000> : vector<8xf32>
    %61 = vector.multi_reduction <maximumf>, %33, %cst_37 [0] : vector<16x8xf32> to vector<8xf32>
    %62 = vector.shape_cast %61 : vector<8xf32> to vector<1x8xf32>
    %63 = arith.maximumf %60, %62 : vector<1x8xf32>
    %64 = arith.maximumf %58, %63 : vector<1x8xf32>
    %65 = vector.broadcast %64 : vector<1x8xf32> to vector<16x8xf32>
    %66 = arith.subf %31, %65 : vector<16x8xf32>
    %67 = math.exp %66 : vector<16x8xf32>
    %68 = vector.broadcast %64 : vector<1x8xf32> to vector<16x8xf32>
    %69 = arith.subf %33, %68 : vector<16x8xf32>
    %70 = math.exp %69 : vector<16x8xf32>
    %cst_38 = arith.constant dense<0.000000e+00> : vector<1x8xf32>
    %71 = tpu.matmul %34, %67, %cst_38 {dimension_numbers = #tpu.dot_dimension_numbers<[1], [0], [0], [1], [0, 0, 1, 1], [], []>} : vector<1x16xf32>, vector<16x8xf32>, vector<1x8xf32> -> vector<1x8xf32>
    %cst_39 = arith.constant dense<0.000000e+00> : vector<1x8xf32>
    %72 = tpu.matmul %34, %70, %cst_39 {dimension_numbers = #tpu.dot_dimension_numbers<[1], [0], [0], [1], [0, 0, 1, 1], [], []>} : vector<1x16xf32>, vector<16x8xf32>, vector<1x8xf32> -> vector<1x8xf32>
    %73 = arith.addf %71, %72 : vector<1x8xf32>
    %74 = arith.subf %58, %64 : vector<1x8xf32>
    %75 = math.exp %74 : vector<1x8xf32>
    %c0_40 = arith.constant 0 : index
    %c0_41 = arith.constant 0 : index
    %76 = vector.load %arg12[%c0_40, %c0_41] : memref<1x8xf32, #tpu.memory_space<vmem>>, vector<1x8xf32>
    %77 = arith.mulf %75, %76 : vector<1x8xf32>
    %78 = arith.addf %77, %73 : vector<1x8xf32>
    %c0_42 = arith.constant 0 : index
    %c0_43 = arith.constant 0 : index
    %79 = vector.load %arg12[%c0_42, %c0_43] : memref<1x8xf32, #tpu.memory_space<vmem>>, vector<1x8xf32>
    tpu.vector_store %arg12[%c0_42, %c0_43], %78 {strides = array<i32>} : memref<1x8xf32, #tpu.memory_space<vmem>>, vector<1x8xf32>,
    %c0_44 = arith.constant 0 : index
    %c0_45 = arith.constant 0 : index
    %80 = vector.load %arg11[%c0_44, %c0_45] : memref<1x8xf32, #tpu.memory_space<vmem>>, vector<1x8xf32>
    tpu.vector_store %arg11[%c0_44, %c0_45], %64 {strides = array<i32>} : memref<1x8xf32, #tpu.memory_space<vmem>>, vector<1x8xf32>,
    %c0_i32_46 = arith.constant 0 : i32
    %81 = arith.cmpi eq, %arg1, %c0_i32_46 : i32
    %82 = arith.extui %81 : i1 to i32
    %c0_i32_47 = arith.constant 0 : i32
    %83 = arith.cmpi ne, %82, %c0_i32_47 : i32
    scf.if %83 {
      %c0_48 = arith.constant 0 : index
      %c0_49 = arith.constant 0 : index
      %84 = vector.load %arg9[%c0_48, %c0_49] : memref<1x8xf32, #tpu.memory_space<vmem>>, vector<1x8xf32>
      %c0_50 = arith.constant 0 : index
      %c0_51 = arith.constant 0 : index
      %85 = vector.load %arg10[%c0_50, %c0_51] : memref<1x8xf32, #tpu.memory_space<vmem>>, vector<1x8xf32>
      %86 = math.log %85 : vector<1x8xf32>
      %87 = arith.addf %84, %86 : vector<1x8xf32>
      %c0_52 = arith.constant 0 : index
      %c0_53 = arith.constant 0 : index
      %88 = vector.load %arg11[%c0_52, %c0_53] : memref<1x8xf32, #tpu.memory_space<vmem>>, vector<1x8xf32>
      %c0_54 = arith.constant 0 : index
      %c0_55 = arith.constant 0 : index
      %89 = vector.load %arg12[%c0_54, %c0_55] : memref<1x8xf32, #tpu.memory_space<vmem>>, vector<1x8xf32>
      %90 = math.log %89 : vector<1x8xf32>
      %91 = arith.addf %88, %90 : vector<1x8xf32>
      %92 = arith.addf %87, %91 : vector<1x8xf32>
      %c0_56 = arith.constant 0 : index
      %c0_57 = arith.constant 0 : index
      %c0_58 = arith.constant 0 : index
      %93 = vector.load %arg6[%c0_56, %c0_57, %c0_58] : memref<1x1x8xf32, #tpu.memory_space<vmem>>, vector<1x1x8xf32>
      %94 = vector.shape_cast %93 : vector<1x1x8xf32> to vector<1x8xf32>
      %95 = vector.shape_cast %92 : vector<1x8xf32> to vector<1x1x8xf32>
      tpu.vector_store %arg6[%c0_56, %c0_57, %c0_58], %95 {strides = array<i32>} : memref<1x1x8xf32, #tpu.memory_space<vmem>>, vector<1x1x8xf32>,
    } else {
    }
    return
  }
  func.func @transform_0(%arg0: i32, %arg1: i32) -> (i32, i32) {
    %c0_i32 = arith.constant 0 : i32
    %c0_i32_0 = arith.constant 0 : i32
    return %arg0, %c0_i32 : i32, i32
  }
  func.func @transform_1(%arg0: i32, %arg1: i32) -> (i32, i32) {
    %c0_i32 = arith.constant 0 : i32
    %c0_i32_0 = arith.constant 0 : i32
    return %arg0, %c0_i32 : i32, i32
  }
  func.func @transform_2(%arg0: i32, %arg1: i32) -> (i32, i32) {
    %c0_i32 = arith.constant 0 : i32
    %c0_i32_0 = arith.constant 0 : i32
    return %arg1, %c0_i32 : i32, i32
  }
  func.func @transform_3(%arg0: i32, %arg1: i32) -> (i32, i32) {
    %c0_i32 = arith.constant 0 : i32
    %c0_i32_0 = arith.constant 0 : i32
    return %arg1, %c0_i32 : i32, i32
  }
  func.func @transform_4(%arg0: i32, %arg1: i32) -> (i32, i32, i32) {
    %c0_i32 = arith.constant 0 : i32
    %c0_i32_0 = arith.constant 0 : i32
    %c0_i32_1 = arith.constant 0 : i32
    return %arg0, %c0_i32, %c0_i32_0 : i32, i32, i32
  }
}

</mosaic_0001>

<bundles_post_ra>
// kernel: tpu_custom_call.1
= control target key start
LH: loop header
LB: loop body
LE: loop exit
PB: predicated region body
PF: predicated region fallthrough
CT: control target
= control target key end

     0   :  { %s2042_s0 = inlined_call_operand.hbm [shape: f32[16,128], index: 0, kind: input, shape index: {}]   ;;  %s2043_s1 = inlined_call_operand.hbm [shape: f32[16,128], index: 1, kind: input, shape index: {}]   ;;  %s2044_s2 = inlined_call_operand.hbm [shape: f32[16,128], index: 2, kind: input, shape index: {}]   ;;  %s2045_s3 = inlined_call_operand.hbm [shape: f32[16,128], index: 3, kind: input, shape index: {}]   ;;  %s2046_s4 = inlined_call_operand.hbm [shape: f32[2,1,8], index: 4, kind: output, shape index: {}]  }
   0x1   :  { %2052 = sst [smem:[#allocation23_spill]] %s2044_s2 }
   0x2   :  { %2053 = sst [smem:[#allocation24_spill]] %s2045_s3 }
   0x3   :  { %9 = vsyncpa [#allocation9], 0 }
   0x4   :  { %11 = vsyncpa [#allocation9 + $0x1], 0 }
   0x5   :  { %12 = vsyncpa [#allocation12], 0 }
   0x6   :  { %14 = vsyncpa [#allocation12 + $0x1], 0 }
   0x7   :  { %15 = vsyncpa [#allocation15], 0 }
   0x8   :  { %16 = vsyncpa [#allocation10], 0 }
   0x9   :  { %18 = vsyncpa [#allocation10 + $0x1], 0  ;;  %s1700_s15 = smov 0   ;;  %s1702_s16 = smov 0  }
   0xa   :  { %s1704_s17 = smov 0   ;;  %s1706_s18 = smov 0  }
   0xb   :  { %s1708_s19 = smov 0   ;;  %s1710_s20 = smov 0  }
   0xc LB: > { %s1731_s21 = sadd.s32 4294967295, %s1661_s20   ;;  %s1210_s22 = sadd.s32 4294967294, %s1661_s20   ;;  %s1661_s20 = sphi %s1710_s20, %s24_s20   ;;  %s1657_s19 = sphi %s1708_s19, %s2081_s19   ;;  %s1653_s18 = sphi %s1706_s18, %s2080_s18   ;;  %s1649_s17 = sphi %s1704_s17, %s2079_s17   ;;  %s1645_s16 = sphi %s1702_s16, %s2078_s16   ;;  %s1641_s15 = sphi %s1700_s15, %s2077_s15  }
   0xd   : > { %p56_p0 = scmp.ne.s32.totalorder %s1645_s16, %s1641_s15  ;;  %p2047_p1 = scmp.eq.s32.totalorder %s1731_s21, 0 }
   0xe   : > { %p164_p3 = scmp.eq.s32.totalorder %s1210_s22, 1  ;;  %p1211_p5 = scmp.ge.s32.totalorder %s1661_s20, 1 }
   0xf   : > { %p1740_p4 = por %p2047_p1, %p56_p0  ;;  %p171_p7 = scmp.lt.s32.totalorder %s1661_s20, 3 }
  0x10   : > { %p1745_p6 = por %p164_p3, %p56_p0  ;;  %s1663_s26 = smov [#allocation13]  }
  0x11   : > { %s2054_s23 = scalar_select %p1740_p4, 1, 0 }
  0x12   : > { %s2055_s24 = scalar_select %p1745_p6, 1, 0 }
  0x13   : > { %p1750_p8 = pnand %p1211_p5, %p171_p7  ;;  %s186_s27 = sshll.u32 %s1663_s26, 4  ;;  %s1754_s27 = int_to_ptr.vmem [resolvable:$true] %s186_s27 }
  0x14   : > { %s1664_s29 = smov [#allocation14]   ;;  %s2058_s2 = sld [smem:[#allocation23_spill]] }
  0x15   : > { %s2056_s25 = scalar_select %p1750_p8, 1, 0 }
  0x16   : > { %p1348_p9 = pneg %p1750_p8  ;;  %s202_s30 = sshll.u32 %s1664_s29, 4  ;;  %s1765_s30 = int_to_ptr.vmem [resolvable:$true] %s202_s30 }
  0x18   : > { %p1761_p11 = pnand %p1348_p9, %p2047_p1 }
  0x1a   : > { %s1451_s7 = scalar_lea.hbm %s2058_s2, 256  ;;  %p1453_p13 = pneg %p1761_p11 }
  0x1b   : > { %p1452_p12 = scmp.ne.s32.totalorder %s2058_s2, %s1451_s7  ;;  %p1458_p5 = scmp.lt.u32.totalorder %s1451_s7, %s2058_s2 }
  0x1d   : > { %p1454_p0 = pnand %p1453_p13, %p1452_p12 }
  0x1f   : > { %p1455_p3 = pneg %p1454_p0 }
  0x21   : > { %p1460_p7 = pnand %p1458_p5, %p1455_p3 }
  0x23   : > { %1463 = shalt.err (!%p1460_p7)
}
  0x24   : > { %s1464_s12 = scalar_lea.vmem %s1754_s27, 256  ;;  %p1472_p2 = scmp.lt.s32.totalorder %s1754_s27, %s1754_s27 }
  0x25   : > { %p1465_p9 = scmp.ne.s32.totalorder %s1754_s27, %s1464_s12  ;;  %p1473_p12 = scmp.lt.s32.totalorder %s1464_s12, %s1464_s12 }
  0x27   : > { %p1467_p10 = pnand %p1465_p9, %p1453_p13  ;;  %p1474_p0 = por %p1473_p12, %p1472_p2 }
  0x29   : > { %p1468_p1 = pneg %p1467_p10 }
  0x2b   : > { %p1475_p6 = pnand %p1474_p0, %p1468_p1 }
  0x2d   : > { %1478 = shalt.err (!%p1475_p6)
}
  0x2e   : > { %s1665_s13 = smov 128   ;;  %s1666_s14 = smov 8  }
  0x2f   : > { %1351 = dma.hbm_to_vmem [thread:$0]  (!%p1761_p11), %s2058_s2, 256, %s1754_s27, [#allocation12], %s1665_s13, %s1665_s13, %s1666_s14  }
  0x30   : > { %s2059_s3 = sld [smem:[#allocation24_spill]] }
  0x36   : > { %s1479_s6 = scalar_lea.hbm %s2059_s3, 256 }
  0x37   : > { %p1480_p2 = scmp.ne.s32.totalorder %s2059_s3, %s1479_s6  ;;  %p1486_p10 = scmp.lt.u32.totalorder %s1479_s6, %s2059_s3 }
  0x39   : > { %p1482_p1 = pnand %p1480_p2, %p1453_p13 }
  0x3b   : > { %p1483_p6 = pneg %p1482_p1 }
  0x3d   : > { %p1488_p3 = pnand %p1486_p10, %p1483_p6 }
  0x3f   : > { %1491 = shalt.err (!%p1488_p3)
}
  0x40   : > { %s1492_s27 = scalar_lea.vmem %s1765_s30, 256  ;;  %p1500_p12 = scmp.lt.s32.totalorder %s1765_s30, %s1765_s30 }
  0x41   : > { %p1493_p5 = scmp.ne.s32.totalorder %s1765_s30, %s1492_s27  ;;  %p1501_p0 = scmp.lt.s32.totalorder %s1492_s27, %s1492_s27 }
  0x43   : > { %p1495_p7 = pnand %p1493_p5, %p1453_p13  ;;  %p1502_p2 = por %p1501_p0, %p1500_p12 }
  0x45   : > { %p1496_p9 = pneg %p1495_p7 }
  0x47   : > { %p1503_p1 = pnand %p1502_p2, %p1496_p9 }
  0x49   : > { %1506 = shalt.err (!%p1503_p1)
}
  0x4a   : > { %1354 = dma.hbm_to_vmem [thread:$0]  (!%p1761_p11), %s2059_s3, 256, %s1765_s30, [#allocation15], %s1665_s13, %s1665_s13, %s1666_s14  }
  0x4b   : > { %s36_s22 = sadd.s32 1, %s1657_s19  ;;  %s43_s26 = sadd.s32 1, %s1649_s17 }
  0x4c   : > { %p38_p13 = scmp.ge.s32.totalorder %s36_s22, 2  ;;  %p50_p6 = scmp.ne.s32.totalorder %s1649_s17, %s1645_s16 }
  0x4d   : > { %p51_p10 = scmp.eq.s32.totalorder %s1661_s20, 0  ;;  %p1368_p3 = scmp.lt.s32.totalorder %s1661_s20, 2 }
  0x4e   : > { %s2083_s22 = smov (%p38_p13, %s36_s22), 0  ;;  %p2061_p7 = scmp.eq.s32.totalorder %s1731_s21, 1 }
  0x4f   : > { %2060 = sst [smem:[#allocation22_spill]] %s2083_s22  ;;  %p52_p5 = por %p51_p10, %p50_p6 }
  0x50   : > { %p1829_p9 = por %p2061_p7, %p50_p6  ;;  %s40_s29 = ssub.s32 %s1657_s19, %s2083_s22 }
  0x51   : > { %s216_s5 = sand.u32 1, %s1649_s17   ;;  %p41_p12 = scmp.eq.s32.totalorder %s40_s29, 0 }
  0x52   : > { %s2062_s28 = scalar_select %p1829_p9, 1, 0 }
  0x53   : > { %s1836_s30 = sshll.u32 %s216_s5, 3  ;;  %s1216_s13 = sshll.u32 %s1657_s19, 7 }
  0x54   : > { %s1840_s14 = scalar_select %p41_p12, %s1649_s17, %s43_s26  }
  0x55   : > { %s1845_s8 = scalar_lea.hbm %s2042_s0, %s1216_s13  ;;  %s220_s9 = scalar_lea.vmem [#allocation8], %s1836_s30 }
  0x56   : > { %s227_s10 = sshll.u32 %s220_s9, 4  ;;  %p1850_p11 = pnand %p1368_p3, %p52_p5  ;;  %s1854_s10 = int_to_ptr.vmem [resolvable:$true] %s227_s10 }
  0x57   : > { %s1859_s26 = scalar_lea.hbm %s2043_s1, %s1216_s13  ;;  %s217_s29 = scalar_lea.sflag [#allocation9], %s216_s5 }
  0x58   : > { %s1507_s6 = scalar_lea.hbm %s1845_s8, 128  ;;  %p1509_p2 = pneg %p1850_p11 }
  0x59   : > { %p1508_p0 = scmp.ne.s32.totalorder %s1845_s8, %s1507_s6  ;;  %s1512_s2 = scalar_lea.hbm %s2042_s0, 256 }
  0x5a   : > { %p1513_p6 = scmp.lt.u32.totalorder %s1845_s8, %s2042_s0  ;;  %p1514_p10 = scmp.lt.u32.totalorder %s1512_s2, %s1507_s6 }
  0x5b   : > { %p1510_p1 = pnand %p1509_p2, %p1508_p0  ;;  %p1516_p5 = scmp.lt.u32.totalorder %s1507_s6, %s1845_s8 }
  0x5c   : > { %p1515_p3 = por %p1514_p10, %p1513_p6 }
  0x5d   : > { %p1511_p13 = pneg %p1510_p1 }
  0x5e   : > { %p1517_p7 = por %p1516_p5, %p1515_p3 }
  0x60   : > { %p1518_p12 = pnand %p1517_p7, %p1511_p13 }
  0x62   : > { %1521 = shalt.err (!%p1518_p12)
}
  0x63   : > { %s1522_s5 = scalar_lea.vmem %s1854_s10, 128  ;;  %s1667_s13 = smov [#allocation8]  }
  0x64   : > { %p1523_p0 = scmp.ne.s32.totalorder %s1854_s10, %s1522_s5  ;;  %s1527_s11 = sshll.u32 %s1667_s13, 4  ;;  %s1528_s11 = int_to_ptr.vmem [resolvable:$false] %s1527_s11 }
  0x65   : > { %s1529_s3 = scalar_lea.vmem %s1528_s11, 256  ;;  %p1530_p4 = scmp.lt.s32.totalorder %s1854_s10, %s1528_s11 }
  0x66   : > { %p1525_p1 = pnand %p1523_p0, %p1509_p2  ;;  %p1531_p6 = scmp.lt.s32.totalorder %s1529_s3, %s1522_s5 }
  0x68   : > { %p1526_p9 = pneg %p1525_p1  ;;  %p1532_p10 = por %p1531_p6, %p1530_p4 }
  0x6a   : > { %p1533_p3 = pnand %p1532_p10, %p1526_p9 }
  0x6c   : > { %1536 = shalt.err (!%p1533_p3)
}
  0x6d   : > { %1358 = dma.hbm_to_vmem [thread:$0]  (!%p1850_p11), %s1845_s8, 128, %s1854_s10, %s217_s29  }
  0x6e   : > { %s234_s2 = sand.u32 1, %s1661_s20   ;;  %s238_s22 = scalar_lea.vmem [#allocation11], %s1836_s30 }
  0x6f   : > { %s245_s12 = sshll.u32 %s238_s22, 4  ;;  %s235_s6 = scalar_lea.sflag [#allocation12], %s234_s2  ;;  %s246_s12 = int_to_ptr.vmem [resolvable:$true] %s245_s12 }
  0x70   : > { %s1537_s7 = scalar_lea.hbm %s1859_s26, 128  ;;  %s1542_s13 = scalar_lea.hbm %s2043_s1, 256 }
  0x71   : > { %p1538_p4 = scmp.ne.s32.totalorder %s1859_s26, %s1537_s7  ;;  %p1543_p5 = scmp.lt.u32.totalorder %s1859_s26, %s2043_s1 }
  0x72   : > { %p1544_p7 = scmp.lt.u32.totalorder %s1542_s13, %s1537_s7  ;;  %p1546_p0 = scmp.lt.u32.totalorder %s1537_s7, %s1859_s26 }
  0x73   : > { %p1540_p9 = pnand %p1538_p4, %p1509_p2 }
  0x74   : > { %p1545_p12 = por %p1544_p7, %p1543_p5 }
  0x75   : > { %p1541_p13 = pneg %p1540_p9 }
  0x76   : > { %p1547_p1 = por %p1546_p0, %p1545_p12 }
  0x78   : > { %p1548_p6 = pnand %p1547_p1, %p1541_p13 }
  0x7a   : > { %1551 = shalt.err (!%p1548_p6)
}
  0x7b   : > { %s1552_s30 = scalar_lea.vmem %s246_s12, 128  ;;  %s1668_s8 = smov [#allocation11]  }
  0x7c   : > { %p1553_p10 = scmp.ne.s32.totalorder %s246_s12, %s1552_s30  ;;  %s1557_s10 = sshll.u32 %s1668_s8, 4  ;;  %s1558_s10 = int_to_ptr.vmem [resolvable:$false] %s1557_s10 }
  0x7d   : > { %s1559_s29 = scalar_lea.vmem %s1558_s10, 256  ;;  %p1560_p9 = scmp.lt.s32.totalorder %s246_s12, %s1558_s10 }
  0x7e   : > { %p1555_p3 = pnand %p1553_p10, %p1509_p2  ;;  %p1561_p8 = scmp.lt.s32.totalorder %s1559_s29, %s1552_s30 }
  0x80   : > { %p1556_p4 = pneg %p1555_p3  ;;  %p1562_p5 = por %p1561_p8, %p1560_p9 }
  0x82   : > { %p1563_p7 = pnand %p1562_p5, %p1556_p4 }
  0x84   : > { %1566 = shalt.err (!%p1563_p7)
}
  0x85   : > { %1361 = dma.hbm_to_vmem [thread:$0]  (!%p1850_p11), %s1859_s26, 128, %s246_s12, %s235_s6  }
  0x86   : > { %p2064_p13 = scmp.ne.s32.totalorder %s2056_s25, 0 }
  0x87   : > { %s1910_s2 = sand.u32 (!%p2064_p13), 1, %s1645_s16   ;;  %p2065_p2 = scmp.ne.s32.totalorder (!%p2064_p13), %s2054_s23, 0 }
  0x88   : > { %254 = sbr.rel (%p2064_p13) target bundleno = 678 (0x2a6), region = 36  ;;  %s1220_s22 = sshll.u32 (!%p2064_p13), %s1910_s2, 3 }
  0x89   : > { %s257_s7 = scalar_lea.sflag (!%p2064_p13), [#allocation9], %s1910_s2  ;;  %s260_s9 = scalar_lea.vmem (!%p2064_p13), [#allocation8], %s1220_s22 }
  0x8f   : > { %1620 = dma.done.wait (%p2065_p2), %s257_s7, 128  }
  0x90   : > { %1622 = vsyncadd (%p2065_p2), %s257_s7, 4294967168  ;;  %s265_s27 = sand.u32 1, %s1731_s21   ;;  %s269_s25 = scalar_lea.vmem [#allocation11], %s1220_s22 }
  0x91   : > { %s266_s26 = scalar_lea.sflag [#allocation12], %s265_s27 }
  0x92   : > { %1624 = dma.done.wait (%p2065_p2), %s266_s26, 128  }
  0x93   : > { %1626 = vsyncadd (%p2065_p2), %s266_s26, 4294967168  ;;  %p2066_p8 = scmp.eq.s32.totalorder %s1731_s21, 0 }
  0x95   : > { %1628 = dma.done.wait (%p2066_p8), [#allocation12], 256   ;;  %p2067_p11 = pmov %p2066_p8 }
  0x96   : > { %p2068_p12 = pmov %p2066_p8 }
  0x97   : > { %1630 = vsyncadd (%p2067_p11), [#allocation12], 4294967040 }
  0x98   : > { %1632 = dma.done.wait (%p2068_p12), [#allocation15], 256   ;;  %p2069_p0 = pmov %p2066_p8 }
  0x99   : > { %v312_v0 = vld [vmem:[%s260_s9] sm:$0xff]  ;;  %v327_v1 = vld [vmem:[#allocation14] sm:$0xff]  ;;  %v328_v6 = vld [vmem:[#allocation14 + $0x8] sm:$0xff]  ;;  %s1224_s21 = sshll.u32 %s1653_s18, 3  ;;  %vm318_vm0 = vcmask 57344   ;;  %v1669_v8 = vmov -inf   ;;  %v639_v11 = vlaneseq }
  0x9a   : > { %1634 = vsyncadd (%p2069_p0), [#allocation15], 4294967040  ;;  %v325_v2 = vld [vmem:[#allocation13] sm:$0xff]  ;;  %v313_v3 = vmul.f32 10.0, %v312_v0  ;;  %1259 = vmatprep.mubr.f32.mxu0 %v327_v1  ;;  %v315_v4 = vld [vmem:[%s269_s25] sm:$0xff]  ;;  %s631_s23 = sadd.s32 8, %s1224_s21  ;;  %v647_v15 = vstv %s1224_s21 }
  0x9b   : > { %1264 = vmatprep.mubr.f32.mxu1 %v325_v2  ;;  %v316_v5 = vmul.f32 10.0, %v315_v4  ;;  %v326_v7 = vld [vmem:[#allocation13 + $0x8] sm:$0xff]  ;;  %p1225_p1 = scmp.gt.s32.totalorder %s631_s23, 0  ;;  %p634_p6 = scmp.lt.s32.totalorder %s1224_s21, 16  ;;  %319 = vst.msk [vmem:[#allocation4] sm:$0x1] %vm318_vm0, %v1669_v8 }
  0x9c   : > { %1257 = vmatprep.subr.mxu0 %v313_v3  ;;  %1262 = vmatprep.subr.mxu1 %v313_v3  ;;  %321 = vst.msk [vmem:[#allocation6] sm:$0x1] %vm318_vm0, %v1669_v8  ;;  %v1670_v9 = vmov 0.0   ;;  %v1671_v10 = vmov 0.0|0.0   ;;  %vm1672_vm1 = vmmov 0   ;;  %v1948_v12 = vshrl.u32 %v639_v11, 7 }
  0x9d   : > { %1258 = vmatpush3.xpose.msra.mxu0 %v313_v3  ;;  %1263 = vmatpush3.xpose.msra.mxu1 %v313_v3  ;;  %p1932_p10 = pnand %p1225_p1, %p634_p6  ;;  %320 = vst.msk [vmem:[#allocation5] sm:$0x1] %vm318_vm0, %v1670_v9  ;;  %322 = vst.msk [vmem:[#allocation7] sm:$0x1] %vm318_vm0, %v1670_v9  ;;  %v643_v13 = vand.u32 127, %v639_v11  ;;  %vm682_vm2 = vcmask 64512  }
  0x9e   : > { %1267 = vmatprep.subr.mxu0 %v316_v5  ;;  %1272 = vmatprep.subr.mxu1 %v316_v5  ;;  %v684_v21 = vsel %vm682_vm2, -1e+09, %v1669_v8  ;;  %vm721_vm6 = vcmask 130048   ;;  %s1230_s13 = sshll.u32 %s1653_s18, 4  ;;  %s305_s11 = scalar_lea.vmem [#allocation16], %s1910_s2 }
  0x9f   : > { %s1371_s6 = scalar_select %p1932_p10, 0, 1  ;;  %v644_v14 = vsub.s32 %v1948_v12, %v643_v13 }
  0xa0   : > { %1260 = vmatmul.mubr.f32.vlgmr.msra.gmra.mrb[0].mxu0 %v328_v6  ;;  %1265 = vmatmul.mubr.f32.vlgmr.msra.gmra.mrb[0].mxu1 %v326_v7  ;;  %s1338_s5 = scalar_select %p1932_p10, 1, 0 }
  0xa1   : > { %1268 = vmatpush3.xpose.msra.mxu0 %v316_v5  ;;  %1273 = vmatpush3.xpose.msra.mxu1 %v316_v5  ;;  %v1331_v16 = vstv %s1371_s6  ;;  %vm1955_vm3 = vcmp.eq.s32.totalorder %v644_v14, %v647_v15  ;;  %s1089_s3 = sshll.u32 %s305_s11, 4  ;;  %s1992_s10 = scalar_lea.hbm %s2046_s4, %s1230_s13  ;;  %s1994_s3 = int_to_ptr.vmem [resolvable:$true] %s1089_s3 }
  0xa2   : > { %1269 = vmatprep.mubr.f32.mxu0 %v325_v2  ;;  %1274 = vmatprep.mubr.f32.mxu1 %v327_v1  ;;  %v1339_v17 = vstv %s1338_s5  ;;  %vm1332_vm4 = vcmp.ne.s32.totalorder %v1331_v16, 0  ;;  %v681_v63 = vld [vmem:[#allocation4] sm:$0x1]  ;;  %v706_v1 = vsub.s32 0, %v1948_v12  ;;  %s1077_s29 = scalar_lea.sflag [#allocation10], %s1910_s2  ;;  %s1567_s22 = scalar_lea.vmem %s1994_s3, 16 }
  0xa3   : > { %1305 = vmatprep.subr.bf16.mxu0 %v1671_v10  ;;  %1308 = vmatprep.subr.bf16.mxu1 %v1671_v10  ;;  %vm1340_vm5 = vcmp.ne.s32.totalorder %v1339_v17, 0  ;;  %p1568_p3 = scmp.ne.s32.totalorder %s1994_s3, %s1567_s22  ;;  %p2073_p4 = scmp.ne.s32.totalorder %s2062_s28, 0 }
  0xa4   : > { %1270 = vmatmul.mubr.f32.vlgmr.msra.gmra.mrb[2].mxu0 %v326_v7  ;;  %1275 = vmatmul.mubr.f32.vlgmr.msra.gmra.mrb[2].mxu1 %v328_v6  ;;  %v874_v6 = vld [vmem:[#allocation6] sm:$0x1]  ;;  %s1674_s18 = smov [#allocation16]  }
  0xa5   : > { %1281 = vmatprep.mubr.msk.f32.mxu0 %vm1672_vm1, %v1670_v9  ;;  %1288 = vmatprep.mubr.msk.f32.mxu1 %vm1672_vm1, %v1670_v9  ;;  %p1569_p9 = pnand %p1568_p3, %p2073_p4  ;;  %s1571_s7 = sshll.u32 %s1674_s18, 4  ;;  %s1572_s7 = int_to_ptr.vmem [resolvable:$false] %s1571_s7 }
  0xa6   : > { %s1573_s9 = scalar_lea.vmem %s1572_s7, 32  ;;  %p1574_p7 = scmp.lt.s32.totalorder %s1994_s3, %s1572_s7 }
  0xa7   : > { %p1570_p5 = pneg %p1569_p9  ;;  %p1575_p13 = scmp.lt.s32.totalorder %s1573_s9, %s1567_s22 }
  0xa9   : > { %p1576_p2 = por %p1575_p13, %p1574_p7 }
  0xab   : > { %p1577_p8 = pnand %p1576_p2, %p1570_p5 }
 0x173   : > { %v1261_v19 = vpop.f32.mrb[0].mxu0  ;;  %v1266_v20 = vpop.f32.mrb[0].mxu1 }
 0x174   : > { %v395_v22 = vpop.f32.mrb[1].mxu0  ;;  %v470_v23 = vpop.f32.mrb[1].mxu1 }
 0x175   : > { %v683_v24 = vsel %vm682_vm2, %v395_v22, -inf  ;;  %v650_v25 = vsel %vm1955_vm3, -1e+09, %v470_v23 }
 0x176   : > { %v685_v26 = vmax.f32 %v683_v24, %v684_v21  ;;  %v1333_v27 = vsel %vm1332_vm4, %v650_v25, 0 }
 0x177   : > { %v1341_v28 = vsel %vm1340_vm5, %v470_v23, %v1333_v27  ;;  %v1271_v29 = vpop.f32.mrb[2].mxu0  ;;  %v1276_v30 = vpop.f32.mrb[2].mxu1 }
 0x178   : > { %v686_v31 = vrot.slane %v685_v26, 4  ;;  %v692_v32 = vsel %vm682_vm2, %v1341_v28, -inf  ;;  %v545_v33 = vpop.f32.mrb[3].mxu0  ;;  %v620_v34 = vpop.f32.mrb[3].mxu1 }
 0x179   : > { %v694_v35 = vmax.f32 %v692_v32, %v684_v21  ;;  %v875_v36 = vsel %vm682_vm2, %v545_v33, -inf  ;;  %v652_v37 = vsel %vm1955_vm3, -1e+09, %v620_v34 }
 0x17a   : > { %v687_v38 = vmax.f32 %v685_v26, %v686_v31  ;;  %v877_v39 = vmax.f32 %v875_v36, %v684_v21  ;;  %v1337_v40 = vsel %vm1332_vm4, %v652_v37, 0  ;;  %v1673_v36 = vmov 1.0  }
 0x17b   : > { %v695_v41 = vrot.slane %v694_v35, 4  ;;  %v1345_v42 = vsel %vm1340_vm5, %v620_v34, %v1337_v40  ;;  %v868_v40 = vld [vmem:[#allocation5] sm:$0x1] }
 0x17c   : > { %v688_v43 = vrot.slane %v687_v38, 2  ;;  %v878_v44 = vrot.slane %v877_v39, 4  ;;  %v884_v45 = vsel %vm682_vm2, %v1345_v42, -inf }
 0x17d   : > { %v696_v46 = vmax.f32 %v694_v35, %v695_v41  ;;  %v886_v47 = vmax.f32 %v884_v45, %v684_v21 }
 0x17e   : > { %v689_v48 = vmax.f32 %v687_v38, %v688_v43  ;;  %v879_v49 = vmax.f32 %v877_v39, %v878_v44 }
 0x17f   : > { %v697_v50 = vrot.slane %v696_v46, 2  ;;  %v887_v51 = vrot.slane %v886_v47, 4 }
 0x180   : > { %v880_v52 = vrot.slane %v879_v49, 2  ;;  %v690_v53 = vrot.slane %v689_v48, 1 }
 0x181   : > { %v698_v54 = vmax.f32 %v696_v46, %v697_v50  ;;  %v888_v55 = vmax.f32 %v886_v47, %v887_v51 }
 0x182   : > { %v881_v56 = vmax.f32 %v879_v49, %v880_v52  ;;  %v691_v59 = vmax.f32 %v689_v48, %v690_v53  ;;  %v1056_v48 = vld [vmem:[#allocation7] sm:$0x1] }
 0x183   : > { %v699_v57 = vrot.slane %v698_v54, 1  ;;  %v889_v58 = vrot.slane %v888_v55, 2 }
 0x184   : > { %v882_v61 = vrot.slane %v881_v56, 1 }
 0x185   : > { %v700_v60 = vmax.f32 %v698_v54, %v699_v57  ;;  %v890_v62 = vmax.f32 %v888_v55, %v889_v58 }
 0x186   : > { %v883_v4 = vmax.f32 %v881_v56, %v882_v61 }
 0x187   : > { %v701_v0 = vmax.f32 %v691_v59, %v700_v60  ;;  %v891_v2 = vrot.slane %v890_v62, 1 }
 0x189   : > { %v702_v3 = vmax.f32 %v681_v63, %v701_v0  ;;  %v892_v5 = vmax.f32 %v890_v62, %v891_v2 }
 0x18b   : > { %v707_v7 = vrot.slane %v702_v3, %v706_v1  ;;  %v865_v8 = vsub.f32 %v681_v63, %v702_v3  ;;  %873 = vst.msk [vmem:[#allocation4] sm:$0x1] %vm318_vm0, %v702_v3  ;;  %v893_v11 = vmax.f32 %v883_v4, %v892_v5 }
 0x18d   : > { %v709_v13 = vsub.f32 %v395_v22, %v707_v7  ;;  %v710_v14 = vsub.f32 -1e+09, %v707_v7  ;;  %v715_v15 = vsub.f32 %v1341_v28, %v707_v7  ;;  %v894_v16 = vmax.f32 %v874_v6, %v893_v11 }
 0x18f   : > { %v711_v17 = vmul.f32 1.442695, %v709_v13  ;;  %v713_v18 = vmul.f32 1.442695, %v710_v14  ;;  %v717_v19 = vmul.f32 1.442695, %v715_v15  ;;  %v899_v20 = vrot.slane %v894_v16, %v706_v1 }
 0x190   : > { %1060 = vst.msk [vmem:[#allocation6] sm:$0x1] %vm318_vm0, %v894_v16  ;;  %v1053_v12 = vsub.f32 %v874_v6, %v894_v16 }
 0x191   : > { %1431 = vpow2.f32 %v711_v17  ;;  %v901_v21 = vsub.f32 %v545_v33, %v899_v20  ;;  %v902_v23 = vsub.f32 -1e+09, %v899_v20  ;;  %v907_v24 = vsub.f32 %v1345_v42, %v899_v20 }
 0x192   : > { %1433 = vpow2.f32 %v713_v18  ;;  %v1054_v38 = vmul.f32 1.442695, %v1053_v12  ;;  %v1064_v62 = vld [vmem:[#allocation4] sm:$0x1] }
 0x193   : > { %1435 = vpow2.f32 %v717_v19  ;;  %v903_v25 = vmul.f32 1.442695, %v901_v21  ;;  %v905_v26 = vmul.f32 1.442695, %v902_v23  ;;  %v909_v27 = vmul.f32 1.442695, %v907_v24 }
 0x195   : > { %1437 = vpow2.f32 %v903_v25 }
 0x196   : > { %1439 = vpow2.f32 %v905_v26 }
 0x197   : > { %1441 = vpow2.f32 %v909_v27  ;;  %v1069_v63 = vld [vmem:[#allocation6] sm:$0x1] }
 0x19b   : > { %v1432_v22 = vpop.eup %1431 }
 0x19c   : > { %v1434_v28 = vpop.eup %1433 }
 0x19d   : > { %v1436_v29 = vpop.eup %1435  ;;  %v1309_v30 = vpack.c.bf16 %v1434_v28, %v1432_v22 }
 0x19e   : > { %v1306_v31 = vpack.c.bf16 %v1434_v28, %v1436_v29 }
 0x19f   : > { %v1438_v32 = vpop.eup %1437  ;;  %1310 = vmatpush3.bf16.msra.mxu1 %v1309_v30 }
 0x1a0   : > { %v1440_v34 = vpop.eup %1439  ;;  %1307 = vmatpush3.bf16.msra.mxu0 %v1306_v31  ;;  %1314 = vmatprep.subr.bf16.mxu1 %v1671_v10 }
 0x1a1   : > { %v1442_v33 = vpop.eup %1441  ;;  %1311 = vmatprep.subr.bf16.mxu0 %v1671_v10  ;;  %v1315_v35 = vpack.c.bf16 %v1440_v34, %v1438_v32  ;;  %v866_v10 = vmul.f32 1.442695, %v865_v8 }
 0x1a2   : > { %1289 = vmatmul.mubr.msk.f32.vlgmr.msra.gmra.mrb[4].mxu1 %vm721_vm6, %v1673_v36  ;;  %v1312_v37 = vpack.c.bf16 %v1440_v34, %v1442_v33 }
 0x1a3   : > { %1282 = vmatmul.mubr.msk.f32.vlgmr.msra.gmra.mrb[4].mxu0 %vm721_vm6, %v1673_v36  ;;  %1316 = vmatpush3.bf16.msra.mxu1 %v1315_v35  ;;  %1443 = vpow2.f32 %v866_v10 }
 0x1a4   : > { %1313 = vmatpush3.bf16.msra.mxu0 %v1312_v37  ;;  %1295 = vmatprep.mubr.msk.f32.mxu0 %vm1672_vm1, %v1670_v9  ;;  %1445 = vpow2.f32 %v1054_v38 }
 0x1a5   : > { %1302 = vmatprep.mubr.msk.f32.mxu1 %vm1672_vm1, %v1670_v9 }
 0x1a6   : > { %1303 = vmatmul.mubr.msk.f32.vlgmr.msra.gmra.mrb[6].mxu1 %vm721_vm6, %v1673_v36 }
 0x1a7   : > { %1296 = vmatmul.mubr.msk.f32.vlgmr.msra.gmra.mrb[6].mxu0 %vm721_vm6, %v1673_v36 }
 0x1ad   : > { %v1444_v39 = vpop.eup %1443 }
 0x1ae   : > { %v869_v45 = vmul.f32 %v1444_v39, %v868_v40  ;;  %v1446_v47 = vpop.eup %1445 }
 0x1af   : > { %v1057_v53 = vmul.f32 %v1446_v47, %v1056_v48 }
 0x275   : > { %v861_v41 = vpop.f32.mrb[4].mxu1 }
 0x276   : > { %v791_v42 = vpop.f32.mrb[4].mxu0  ;;  %v1290_v43 = vpop.f32.mrb[5].mxu1 }
 0x277   : > { %v862_v44 = vadd.f32 %v861_v41, %v791_v42  ;;  %v1283_v46 = vpop.f32.mrb[5].mxu0 }
 0x279   : > { %v870_v49 = vadd.f32 %v869_v45, %v862_v44  ;;  %v1049_v9 = vpop.f32.mrb[6].mxu1 }
 0x27a   : > { %v979_v50 = vpop.f32.mrb[6].mxu0  ;;  %v1304_v51 = vpop.f32.mrb[7].mxu1 }
 0x27b   : > { %872 = vst.msk [vmem:[#allocation5] sm:$0x1] %vm318_vm0, %v870_v49  ;;  %v1050_v52 = vadd.f32 %v1049_v9, %v979_v50  ;;  %v1297_v54 = vpop.f32.mrb[7].mxu0 }
 0x27d   : > { %v1058_v55 = vadd.f32 %v1057_v53, %v1050_v52 }
 0x27f   : > { %1059 = vst.msk [vmem:[#allocation7] sm:$0x1] %vm318_vm0, %v1058_v55 }
 0x282   : > { %v1065_v56 = vld [vmem:[#allocation5] sm:$0x1] }
 0x283   : > { %1447 = vlog2.f32 %v1065_v56 }
 0x286   : > { %v1070_v57 = vld [vmem:[#allocation7] sm:$0x1] }
 0x287   : > { %1449 = vlog2.f32 %v1070_v57 }
 0x28d   : > { %v1448_v58 = vpop.eup %1447 }
 0x28e   : > { %v1067_v59 = vmul.f32 0.6931472, %v1448_v58 }
 0x290   : > { %v1068_v0 = vadd.f32 %v1067_v59, %v1064_v62 }
 0x291   : > { %v1450_v60 = vpop.eup %1449 }
 0x292   : > { %v1072_v61 = vmul.f32 0.6931472, %v1450_v60 }
 0x294   : > { %v1073_v1 = vadd.f32 %v1072_v61, %v1069_v63 }
 0x296   : > { %v1074_v2 = vadd.f32 %v1073_v1, %v1068_v0 }
 0x298   : > { %1075 = vst.msk [vmem:[%s305_s11] sm:$0x1] %vm318_vm0, %v1074_v2 }
 0x299   : > { %1580 = shalt.err (!%p1577_p8)
}
 0x29a   : > { %s1581_s2 = scalar_lea.hbm %s1992_s10, 16  ;;  %s1585_s25 = scalar_lea.hbm %s2046_s4, 32 }
 0x29b   : > { %p1582_p11 = scmp.ne.s32.totalorder %s1992_s10, %s1581_s2  ;;  %p1586_p1 = scmp.lt.u32.totalorder %s1992_s10, %s2046_s4 }
 0x29c   : > { %p1587_p6 = scmp.lt.u32.totalorder %s1585_s25, %s1581_s2  ;;  %p1589_p3 = scmp.lt.u32.totalorder %s1581_s2, %s1992_s10 }
 0x29d   : > { %p1583_p12 = pnand %p1582_p11, %p2073_p4 }
 0x29e   : > { %p1588_p10 = por %p1587_p6, %p1586_p1 }
 0x29f   : > { %p1584_p0 = pneg %p1583_p12 }
 0x2a0   : > { %p1590_p9 = por %p1589_p3, %p1588_p10 }
 0x2a2   : > { %p1591_p5 = pnand %p1590_p9, %p1584_p0 }
 0x2a4   : > { %1594 = shalt.err (!%p1591_p5)
}
 0x2a5   : > { %1346 = dma.vmem_to_hbm [thread:$0]  (%p2073_p4), %s1994_s3, 16, %s1992_s10, %s1077_s29  }
 0x2a6 PF: > { %s1101_s12 = sand.u32 1, %s1641_s15   ;;  %p2074_p7 = scmp.ne.s32.totalorder %s2055_s24, 0 }
 0x2a7   : > { %p2075_p13 = scmp.ge.s32.totalorder %s1661_s20, 2  ;;  %s1102_s6 = scalar_lea.sflag [#allocation10], %s1101_s12 }
 0x2a9   : > { %p1363_p2 = pnand %p2075_p13, %p2074_p7 }
 0x2ab   : > { %1636 = dma.done.wait (!%p1363_p2), %s1102_s6, 16  }
 0x2ac   : > { %1638 = vsyncadd (!%p1363_p2), %s1102_s6, 4294967280  ;;  %s24_s20 = sadd.s32 1, %s1661_s20   ;;  %s2076_s28 = sld [smem:[#allocation22_spill]] }
 0x2ad   : > { %p21_p8 = scmp.ge.s32.totalorder %s24_s20, 4   ;;  %s2077_s15 = smov %s1645_s16 }
 0x2ae   : > { %s2078_s16 = smov %s1649_s17  ;;  %s2079_s17 = smov %s1840_s14 }
 0x2af   : > { %s2080_s18 = smov %s1657_s19  ;;  %23 = sbr.rel (!%p21_p8) target bundleno = 12 (0xc), region = 120 }
 0x2b2   : > { %s2081_s19 = smov %s2076_s28 }
 0x2b6   :  { %1106 = vsyncpa [#allocation9], 1 }
 0x2b7   :  { %1108 = vsyncpa [#allocation9 + $0x1], 1 }
 0x2b8   :  { %1109 = vsyncpa [#allocation12], 1 }
 0x2b9   :  { %1111 = vsyncpa [#allocation12 + $0x1], 1 }
 0x2ba   :  { %1112 = vsyncpa [#allocation15], 1 }
 0x2bb   :  { %1113 = vsyncpa [#allocation10], 1 }
 0x2bc   :  { %1115 = vsyncpa [#allocation10 + $0x1], 1 }

</bundles_post_ra>
